<compile_context>
chip_gen: v7x
topology: tpu7x:2x2x1
jax: 0.10.0
libtpu: 0.0.40
codegen_flags: <defaults>
</compile_context>

<pallas_src>
import functools

import jax
import jax.numpy as jnp
from jax.experimental import pallas as pl
from jax.experimental.pallas import tpu as pltpu


# Contract lhs dim 1 with rhs dim 1 (A @ B^T) -- same pattern flash attention
# uses for q @ k^T, so it lowers directly onto the MXU.
_NT_DIM_NUMBERS = (((1,), (1,)), ((), ()))


def _round_up(x, m):
    return ((x + m - 1) // m) * m


def _mlp_kernel(n_layers, compute_dtype, x_ref, *refs):
    """One batch tile of the full MLP.

    refs = (w0, b0, ..., w_{n_layers-1}, b_{n_layers-1}, w_last_row, b_last, out_ref)
      x_ref:      (TILE_B, obs_dim)
      w_l:        (in, out)        b_l:    (1, out)
      w_last_row: (1, layer_size)  b_last: (1, 1)
      out_ref:    (1, TILE_B)   -- batch on lanes (lane-dense stores)
    """
    out_ref = refs[-1]
    p = refs[:-1]

    # bf16 operands into the MXU, f32 accumulation; element-wise work in f32.
    h = x_ref[...].astype(compute_dtype)
    for layer in range(n_layers):  # static unroll: full LLO scheduler visibility
        w = p[2 * layer][...].astype(compute_dtype)
        b = p[2 * layer + 1][...].astype(jnp.float32)
        z = jnp.dot(h, w, preferred_element_type=jnp.float32) + b
        h = jnp.maximum(z, 0.0).astype(compute_dtype)

    # Final Linear(size, 1), computed transposed so the result is lane-major:
    # (1, size) x (TILE_B, size)^T -> (1, TILE_B).
    w_row = p[2 * n_layers][...].astype(compute_dtype)
    b_last = p[2 * n_layers + 1][...].astype(jnp.float32)
    out = jax.lax.dot_general(
        w_row, h, _NT_DIM_NUMBERS, preferred_element_type=jnp.float32) + b_last
    out_ref[...] = out.astype(out_ref.dtype)


def init_baseline_params(key, state_dim, n_layers, layer_size, dtype=jnp.float32):
    """PyTorch-Linear-style init (uniform +/- 1/sqrt(fan_in)); weights [in, out]."""
    dims = [state_dim] + [layer_size] * n_layers + [1]
    params = []
    for i in range(len(dims) - 1):
        fan_in, fan_out = dims[i], dims[i + 1]
        key, wk, bk = jax.random.split(key, 3)
        bound = 1.0 / float(fan_in) ** 0.5
        w = jax.random.uniform(wk, (fan_in, fan_out), dtype, -bound, bound)
        b = jax.random.uniform(bk, (1, fan_out), dtype, -bound, bound)
        params.append((w, b))
    return tuple(params)


@functools.partial(jax.jit, static_argnames=("tile_b", "compute_dtype"))
def baseline_forward(observations, params, tile_b=None, compute_dtype=jnp.bfloat16):
    """Equivalent of BaselineNetwork.forward: [B, obs_dim] -> [B]."""
    batch, obs_dim = observations.shape
    n_layers = len(params) - 1

    # Batch tile: 512 rows is ~85% of HBM roofline and leaves ample VMEM
    # headroom even on v7x (64 MiB). Keep it a multiple of 8; if the grid has
    # more than one step, keep it a multiple of 128 so the (1, TILE_B) output
    # block stays lane-aligned.
    if tile_b is None:
        tile_b = min(512, _round_up(batch, 8))
    tile_b = max(8, _round_up(int(tile_b), 8))
    if batch > tile_b:
        tile_b = _round_up(tile_b, 128)

    num_tiles = pl.cdiv(batch, tile_b)
    b_pad = num_tiles * tile_b
    if b_pad != batch:  # pad the ragged tail; padded rows are sliced off below
        observations = jnp.pad(observations, ((0, b_pad - batch), (0, 0)))

    # Operand list: obs, then (w, b) per hidden layer, then the final layer
    # with its (size, 1) weight flattened to a row vector (1, size).
    operands = [observations]
    for w, b in params[:-1]:
        operands.append(w)
        operands.append(b.reshape(1, -1))
    w_last, b_last = params[-1]
    operands.append(w_last.reshape(1, -1))
    operands.append(b_last.reshape(1, 1))

    in_specs = [pl.BlockSpec((tile_b, obs_dim), lambda i: (i, 0))]
    for arr in operands[1:]:
        # Full-array blocks with constant index map -> DMA'd once, then
        # VMEM-resident for the whole grid.
        in_specs.append(pl.BlockSpec(arr.shape, lambda i: (0, 0)))

    out_specs = pl.BlockSpec((1, tile_b), lambda i: (0, i))
    out_shape = jax.ShapeDtypeStruct((1, b_pad), observations.dtype)

    itemsize = jnp.dtype(observations.dtype).itemsize
    flops = sum(2 * b_pad * w.shape[0] * w.shape[1] for w in operands[1::2])
    param_bytes = sum(int(a.size) * jnp.dtype(a.dtype).itemsize for a in operands[1:])
    bytes_accessed = b_pad * obs_dim * itemsize + param_bytes + b_pad * itemsize

    kernel = functools.partial(_mlp_kernel, n_layers, compute_dtype)
    out = pl.pallas_call(
        kernel,
        out_shape=out_shape,
        grid_spec=pltpu.PrefetchScalarGridSpec(
            num_scalar_prefetch=0,
            grid=(num_tiles,),
            in_specs=in_specs,
            out_specs=out_specs,
        ),
        compiler_params=pltpu.CompilerParams(
            dimension_semantics=("parallel",),
        ),
        cost_estimate=pl.CostEstimate(
            flops=int(flops), transcendentals=0,
            bytes_accessed=int(bytes_accessed)),
    )(*operands)

    # PyTorch's .squeeze(): lane-major [1, B_pad] -> [B].
    return out[0, :batch]


def reference_forward(observations, params, compute_dtype=jnp.bfloat16):
    """Plain-JAX mirror of the kernel math (same bf16 casts, f32 accumulation)."""
    h = observations.astype(compute_dtype)
    for w, b in params[:-1]:
        z = jnp.dot(h, w.astype(compute_dtype),
                    preferred_element_type=jnp.float32) + b.astype(jnp.float32)
        h = jnp.maximum(z, 0.0).astype(compute_dtype)
    w, b = params[-1]
    out = jnp.dot(h, w.astype(compute_dtype),
                  preferred_element_type=jnp.float32) + b.astype(jnp.float32)
    return out[:, 0].astype(observations.dtype)


if __name__ == "__main__":
    # Small shapes consistent with the module: obs_dim=16, n_layers=2 hidden
    # layers of width 32, scalar baseline per sample.
    state_dim, n_layers, layer_size = 16, 2, 32

    key = jax.random.PRNGKey(0)
    key, obs_key, big_key = jax.random.split(key, 3)
    params = init_baseline_params(key, state_dim, n_layers, layer_size)

    # Case 1: tiny batch (single tile).
    obs_small = jax.random.normal(obs_key, (8, state_dim), dtype=jnp.float32)
    out_small = jax.block_until_ready(baseline_forward(obs_small, params))
    ref_small = reference_forward(obs_small, params)
    assert out_small.shape == (8,)
    assert jnp.allclose(out_small, ref_small, atol=2e-2, rtol=2e-2)

    # Case 2: multi-tile grid with a ragged tail (exercises padding + pipelining).
    obs_big = jax.random.normal(big_key, (300, state_dim), dtype=jnp.float32)
    out_big = jax.block_until_ready(baseline_forward(obs_big, params, tile_b=128))
    ref_big = reference_forward(obs_big, params)
    assert out_big.shape == (300,)
    assert jnp.allclose(out_big, ref_big, atol=2e-2, rtol=2e-2)

    # TODO(synk): update_baseline / calculate_advantage (Adam step, MSE backward)
    # are training-side utilities, not part of the forward pass, and are not
    # implemented as kernels.
    print("KERNEL_OK")
</pallas_src>

<mosaic_0001>
module attributes {stable_mosaic.version = 11 : i64} {
  func.func @_mlp_kernel(%arg0: i32, %arg1: memref<8x16xf32, #tpu.memory_space<vmem>>, %arg2: memref<16x32xf32, #tpu.memory_space<vmem>>, %arg3: memref<1x32xf32, #tpu.memory_space<vmem>>, %arg4: memref<32x32xf32, #tpu.memory_space<vmem>>, %arg5: memref<1x32xf32, #tpu.memory_space<vmem>>, %arg6: memref<1x32xf32, #tpu.memory_space<vmem>>, %arg7: memref<1x1xf32, #tpu.memory_space<vmem>>, %arg8: memref<1x8xf32, #tpu.memory_space<vmem>>) attributes {dimension_semantics = [#tpu.dimension_semantics<parallel>], iteration_bounds = array<i64: 1>, scalar_prefetch = 0 : i64, scratch_operands = 0 : i64, tpu.core_type = #tpu.core_type<tc>, window_params = [{transform_indices = @transform_0, window_bounds = array<i64: 8, 16>}, {pipeline_mode = #tpu.pipeline_mode<synchronous>, transform_indices = @transform_1, window_bounds = array<i64: 16, 32>}, {pipeline_mode = #tpu.pipeline_mode<synchronous>, transform_indices = @transform_2, window_bounds = array<i64: 1, 32>}, {pipeline_mode = #tpu.pipeline_mode<synchronous>, transform_indices = @transform_3, window_bounds = array<i64: 32, 32>}, {pipeline_mode = #tpu.pipeline_mode<synchronous>, transform_indices = @transform_4, window_bounds = array<i64: 1, 32>}, {pipeline_mode = #tpu.pipeline_mode<synchronous>, transform_indices = @transform_5, window_bounds = array<i64: 1, 32>}, {pipeline_mode = #tpu.pipeline_mode<synchronous>, transform_indices = @transform_6, window_bounds = array<i64: 1, 1>}, {transform_indices = @transform_7, window_bounds = array<i64: 1, 8>}]} {
    %c0 = arith.constant 0 : index
    %c0_0 = arith.constant 0 : index
    %0 = vector.load %arg1[%c0, %c0_0] : memref<8x16xf32, #tpu.memory_space<vmem>>, vector<8x16xf32>
    %1 = arith.truncf %0 : vector<8x16xf32> to vector<8x16xbf16>
    %c0_1 = arith.constant 0 : index
    %c0_2 = arith.constant 0 : index
    %2 = vector.load %arg2[%c0_1, %c0_2] : memref<16x32xf32, #tpu.memory_space<vmem>>, vector<16x32xf32>
    %3 = arith.truncf %2 : vector<16x32xf32> to vector<16x32xbf16>
    %c0_3 = arith.constant 0 : index
    %c0_4 = arith.constant 0 : index
    %4 = vector.load %arg3[%c0_3, %c0_4] : memref<1x32xf32, #tpu.memory_space<vmem>>, vector<1x32xf32>
    %cst = arith.constant dense<0.000000e+00> : vector<8x32xf32>
    %5 = tpu.matmul %1, %3, %cst {dimension_numbers = #tpu.dot_dimension_numbers<[1], [0], [0], [1], [0, 0, 1, 1], [], []>} : vector<8x16xbf16>, vector<16x32xbf16>, vector<8x32xf32> -> vector<8x32xf32>
    %6 = vector.broadcast %4 : vector<1x32xf32> to vector<8x32xf32>
    %7 = arith.addf %5, %6 : vector<8x32xf32>
    %cst_5 = arith.constant 0.000000e+00 : f32
    %8 = vector.broadcast %cst_5 : f32 to vector<8x32xf32>
    %9 = arith.maximumf %7, %8 : vector<8x32xf32>
    %10 = arith.truncf %9 : vector<8x32xf32> to vector<8x32xbf16>
    %c0_6 = arith.constant 0 : index
    %c0_7 = arith.constant 0 : index
    %11 = vector.load %arg4[%c0_6, %c0_7] : memref<32x32xf32, #tpu.memory_space<vmem>>, vector<32x32xf32>
    %12 = arith.truncf %11 : vector<32x32xf32> to vector<32x32xbf16>
    %c0_8 = arith.constant 0 : index
    %c0_9 = arith.constant 0 : index
    %13 = vector.load %arg5[%c0_8, %c0_9] : memref<1x32xf32, #tpu.memory_space<vmem>>, vector<1x32xf32>
    %cst_10 = arith.constant dense<0.000000e+00> : vector<8x32xf32>
    %14 = tpu.matmul %10, %12, %cst_10 {dimension_numbers = #tpu.dot_dimension_numbers<[1], [0], [0], [1], [0, 0, 1, 1], [], []>} : vector<8x32xbf16>, vector<32x32xbf16>, vector<8x32xf32> -> vector<8x32xf32>
    %15 = vector.broadcast %13 : vector<1x32xf32> to vector<8x32xf32>
    %16 = arith.addf %14, %15 : vector<8x32xf32>
    %cst_11 = arith.constant 0.000000e+00 : f32
    %17 = vector.broadcast %cst_11 : f32 to vector<8x32xf32>
    %18 = arith.maximumf %16, %17 : vector<8x32xf32>
    %19 = arith.truncf %18 : vector<8x32xf32> to vector<8x32xbf16>
    %c0_12 = arith.constant 0 : index
    %c0_13 = arith.constant 0 : index
    %20 = vector.load %arg6[%c0_12, %c0_13] : memref<1x32xf32, #tpu.memory_space<vmem>>, vector<1x32xf32>
    %21 = arith.truncf %20 : vector<1x32xf32> to vector<1x32xbf16>
    %c0_14 = arith.constant 0 : index
    %c0_15 = arith.constant 0 : index
    %22 = vector.load %arg7[%c0_14, %c0_15] : memref<1x1xf32, #tpu.memory_space<vmem>>, vector<1x1xf32>
    %cst_16 = arith.constant dense<0.000000e+00> : vector<1x8xf32>
    %23 = tpu.matmul %21, %19, %cst_16 {dimension_numbers = #tpu.dot_dimension_numbers<[1], [1], [0], [0], [0, 0, 1, 0], [], []>} : vector<1x32xbf16>, vector<8x32xbf16>, vector<1x8xf32> -> vector<1x8xf32>
    %24 = vector.broadcast %22 : vector<1x1xf32> to vector<1x8xf32>
    %25 = arith.addf %23, %24 : vector<1x8xf32>
    %c0_17 = arith.constant 0 : index
    %c0_18 = arith.constant 0 : index
    %26 = vector.load %arg8[%c0_17, %c0_18] : memref<1x8xf32, #tpu.memory_space<vmem>>, vector<1x8xf32>
    tpu.vector_store %arg8[%c0_17, %c0_18], %25 {strides = array<i32>} : memref<1x8xf32, #tpu.memory_space<vmem>>, vector<1x8xf32>,
    return
  }
  func.func @transform_0(%arg0: i32) -> (i32, i32) {
    %c0_i32 = arith.constant 0 : i32
    %c0_i32_0 = arith.constant 0 : i32
    return %arg0, %c0_i32 : i32, i32
  }
  func.func @transform_1(%arg0: i32) -> (i32, i32) {
    %c0_i32 = arith.constant 0 : i32
    %c0_i32_0 = arith.constant 0 : i32
    %c0_i32_1 = arith.constant 0 : i32
    return %c0_i32, %c0_i32_0 : i32, i32
  }
  func.func @transform_2(%arg0: i32) -> (i32, i32) {
    %c0_i32 = arith.constant 0 : i32
    %c0_i32_0 = arith.constant 0 : i32
    %c0_i32_1 = arith.constant 0 : i32
    return %c0_i32, %c0_i32_0 : i32, i32
  }
  func.func @transform_3(%arg0: i32) -> (i32, i32) {
    %c0_i32 = arith.constant 0 : i32
    %c0_i32_0 = arith.constant 0 : i32
    %c0_i32_1 = arith.constant 0 : i32
    return %c0_i32, %c0_i32_0 : i32, i32
  }
  func.func @transform_4(%arg0: i32) -> (i32, i32) {
    %c0_i32 = arith.constant 0 : i32
    %c0_i32_0 = arith.constant 0 : i32
    %c0_i32_1 = arith.constant 0 : i32
    return %c0_i32, %c0_i32_0 : i32, i32
  }
  func.func @transform_5(%arg0: i32) -> (i32, i32) {
    %c0_i32 = arith.constant 0 : i32
    %c0_i32_0 = arith.constant 0 : i32
    %c0_i32_1 = arith.constant 0 : i32
    return %c0_i32, %c0_i32_0 : i32, i32
  }
  func.func @transform_6(%arg0: i32) -> (i32, i32) {
    %c0_i32 = arith.constant 0 : i32
    %c0_i32_0 = arith.constant 0 : i32
    %c0_i32_1 = arith.constant 0 : i32
    return %c0_i32, %c0_i32_0 : i32, i32
  }
  func.func @transform_7(%arg0: i32) -> (i32, i32) {
    %c0_i32 = arith.constant 0 : i32
    %c0_i32_0 = arith.constant 0 : i32
    return %c0_i32, %arg0 : i32, i32
  }
}

</mosaic_0001>

<bundles_post_ra>
// kernel: baseline_forward.1
= control target key start
LH: loop header
LB: loop body
LE: loop exit
PB: predicated region body
PF: predicated region fallthrough
CT: control target
= control target key end

     0   :  { %s516_s0 = inlined_call_operand.hbm [shape: f32[8,16], index: 0, kind: input, shape index: {}]   ;;  %s517_s1 = inlined_call_operand.hbm [shape: f32[16,32], index: 1, kind: input, shape index: {}]   ;;  %s518_s2 = inlined_call_operand.vmem [shape: f32[1,32], index: 2, kind: input, shape index: {}]   ;;  %s519_s3 = inlined_call_operand.hbm [shape: f32[32,32], index: 3, kind: input, shape index: {}]   ;;  %s520_s4 = inlined_call_operand.vmem [shape: f32[1,32], index: 4, kind: input, shape index: {}]   ;;  %s521_s5 = inlined_call_operand.vmem [shape: f32[1,32], index: 5, kind: input, shape index: {}]   ;;  %s522_s6 = inlined_call_operand.<no memory space> [shape: f32[1,1], index: 6, kind: input, shape index: {}]   ;;  %s523_s7 = inlined_call_operand.hbm [shape: f32[1,8], index: 7, kind: output, shape index: {}]  }
   0x1   :  { %v12_v0 = vstv %s522_s6 }
   0x2   :  { %13 = vst [vmem:[#allocation2] sm:$0x1] %v12_v0 }
   0x3   :  { %14 = vsyncpa [#allocation4], 0 }
   0x4   :  { %15 = vsyncpa [#allocation7], 0 }
   0x5   :  { %16 = vsyncpa [#allocation5], 0  ;;  %s398_s26 = smov [#allocation6]   ;;  %s304_s30 = scalar_lea.hbm %s517_s1, 256 }
   0x6   :  { %s32_s27 = sshll.u32 %s398_s26, 4  ;;  %p305_p0 = scmp.ne.s32.totalorder %s517_s1, %s304_s30  ;;  %s33_s27 = int_to_ptr.vmem [resolvable:$true] %s32_s27 }
   0x7   :  { %p308_p1 = scmp.lt.u32.totalorder %s304_s30, %s517_s1 }
   0x9   :  { %p310_p2 = pnand %p308_p1, %p305_p0 }
   0xb   :  { %313 = shalt.err (!%p310_p2)
}
   0xc   :  { %s314_s6 = scalar_lea.vmem %s33_s27, 256  ;;  %p319_p4 = scmp.lt.s32.totalorder %s33_s27, %s33_s27 }
   0xd   :  { %p315_p3 = scmp.ne.s32.totalorder %s33_s27, %s314_s6  ;;  %p320_p5 = scmp.lt.s32.totalorder %s314_s6, %s314_s6 }
   0xf   :  { %p321_p6 = por %p320_p5, %p319_p4 }
  0x11   :  { %p322_p7 = pnand %p321_p6, %p315_p3 }
  0x13   :  { %325 = shalt.err (!%p322_p7)
}
  0x14   :  { %s399_s12 = smov 128   ;;  %s400_s13 = smov 8  }
  0x15   :  { %38 = dma.hbm_to_vmem [thread:$0]  %s517_s1, 256, %s33_s27, [#allocation7], %s399_s12, %s399_s12, %s400_s13  }
  0x16   :  { %s401_s16 = smov [#allocation3]   ;;  %s402_s18 = smov [#allocation8]  }
  0x17   :  { %s23_s17 = sshll.u32 %s401_s16, 4  ;;  %s46_s19 = sshll.u32 %s402_s18, 4  ;;  %s24_s17 = int_to_ptr.vmem [resolvable:$true] %s23_s17  ;;  %s47_s19 = int_to_ptr.vmem [resolvable:$true] %s46_s19 }
  0x18   :  { %s326_s22 = scalar_lea.hbm %s516_s0, 128 }
  0x19   :  { %p327_p8 = scmp.ne.s32.totalorder %s516_s0, %s326_s22  ;;  %p330_p9 = scmp.lt.u32.totalorder %s326_s22, %s516_s0 }
  0x1b   :  { %p332_p10 = pnand %p330_p9, %p327_p8 }
  0x1d   :  { %335 = shalt.err (!%p332_p10)
}
  0x1e   :  { %s336_s1 = scalar_lea.vmem %s24_s17, 128  ;;  %p341_p12 = scmp.lt.s32.totalorder %s24_s17, %s24_s17 }
  0x1f   :  { %p337_p11 = scmp.ne.s32.totalorder %s24_s17, %s336_s1  ;;  %p342_p13 = scmp.lt.s32.totalorder %s336_s1, %s336_s1 }
  0x21   :  { %p343_p0 = por %p342_p13, %p341_p12 }
  0x23   :  { %p344_p1 = pnand %p343_p0, %p337_p11 }
  0x25   :  { %347 = shalt.err (!%p344_p1)
}
  0x26   :  { %26 = dma.hbm_to_vmem [thread:$0]  %s516_s0, 128, %s24_s17, [#allocation4]  }
  0x27   :  { %s348_s8 = scalar_lea.hbm %s519_s3, 512 }
  0x28   :  { %p349_p2 = scmp.ne.s32.totalorder %s519_s3, %s348_s8  ;;  %p352_p3 = scmp.lt.u32.totalorder %s348_s8, %s519_s3 }
  0x2a   :  { %p354_p4 = pnand %p352_p3, %p349_p2 }
  0x2c   :  { %357 = shalt.err (!%p354_p4)
}
  0x2d   :  { %s358_s14 = scalar_lea.vmem %s47_s19, 512  ;;  %p363_p6 = scmp.lt.s32.totalorder %s47_s19, %s47_s19 }
  0x2e   :  { %p359_p5 = scmp.ne.s32.totalorder %s47_s19, %s358_s14  ;;  %p364_p7 = scmp.lt.s32.totalorder %s358_s14, %s358_s14 }
  0x30   :  { %p365_p8 = por %p364_p7, %p363_p6 }
  0x32   :  { %p366_p9 = pnand %p365_p8, %p359_p5 }
  0x34   :  { %369 = shalt.err (!%p366_p9)
}
  0x35   :  { %52 = dma.hbm_to_vmem [thread:$0]  %s519_s3, 512, %s47_s19, [#allocation7], %s399_s12, %s399_s12, %s400_s13  }
  0x36   :  { %392 = dma.done.wait [#allocation4], 128  }
  0x37   :  { %393 = vsyncadd [#allocation4], 4294967168 }
  0x38   :  { %394 = dma.done.wait [#allocation7], 768  }
  0x39   :  { %395 = vsyncadd [#allocation7], 4294966528  ;;  %v403_v1 = vmov 0.0   ;;  %vm404_vm0 = vmmov 0   ;;  %v71_v2 = vld [vmem:[#allocation6] sm:$0xff]  ;;  %v72_v3 = vld [vmem:[#allocation6 + $0x8] sm:$0xff]  ;;  %v194_v34 = vlaneseq }
  0x3a   :  { %274 = vmatprep.subr.bf16.mxu0 %v403_v1  ;;  %276 = vmatprep.mubr.msk.bf16.mxu0 %vm404_vm0, %v403_v1  ;;  %v69_v4 = vld [vmem:[#allocation3] sm:$0xff]  ;;  %v73_v5 = vpack.c.bf16 %v72_v3, %v71_v2  ;;  %vm81_vm1 = vcmask 130048   ;;  %v127_v7 = vld [vmem:[#allocation8] sm:$0xff]  ;;  %v129_v10 = vld [vmem:[#allocation8 + $0x10] sm:$0xff]  ;;  %vm140_vm2 = vcmask 261120   ;;  %v405_v22 = vmov 0  }
  0x3b   :  { %280 = vmatprep.subr.bf16.mxu1 %v403_v1  ;;  %284 = vmatprep.mubr.msk.bf16.mxu1 %vm404_vm0, %v403_v1  ;;  %v70_v6 = vpack.c.bf16 %v69_v4, %v69_v4  ;;  %v128_v8 = vld [vmem:[#allocation8 + $0x8] sm:$0xff]  ;;  %v130_v11 = vld [vmem:[#allocation8 + $0x18] sm:$0xff]  ;;  %v262_v13 = vld [vmem:[%s518_s2] ss:$0 sm:$0xff]  ;;  %v195_v35 = vshrl.u32 %v194_v34, 7  ;;  %vm244_vm3 = vcmask 57344  }
  0x3c   :  { %275 = vmatpush3.bf16.msra.mxu0 %v73_v5  ;;  %v131_v9 = vpack.c.bf16 %v128_v8, %v127_v7  ;;  %v132_v12 = vpack.c.bf16 %v130_v11, %v129_v10  ;;  %v188_v21 = vld [vmem:[#allocation2] sm:$0x1]  ;;  %303 = vset.pattern.permute.xlu0 %v405_v22 }
  0x3d   :  { %288 = vmatprep.subr.bf16.mxu0 %v403_v1  ;;  %191 = vperm.xlu0 %303, %v188_v21   ;;  %v264_v23 = vld [vmem:[%s520_s4] ss:$0 sm:$0xff]  ;;  %v196_v36 = vsub.s32 0, %v195_v35  ;;  %s406_s4 = smov [#allocation9]  }
  0x3e   :  { %281 = vmatpush3.bf16.msra.mxu1 %v131_v9  ;;  %v186_v32 = vld [vmem:[%s521_s5] sm:$0x1]  ;;  %s252_s18 = sshll.u32 %s406_s4, 4  ;;  %s253_s18 = int_to_ptr.vmem [resolvable:$true] %s252_s18 }
  0x3f   :  { %277 = vmatmul.mubr.msk.bf16.vlgmr.msra.gmra.mrb[0].mxu0 %vm81_vm1, %v70_v6  ;;  %282 = vmatprep.subr.bf16.mxu1 %v403_v1  ;;  %v187_v33 = vpack.c.bf16 %v186_v32, %v186_v32  ;;  %s370_s19 = scalar_lea.vmem %s253_s18, 16  ;;  %s374_s5 = scalar_lea.vmem %s253_s18, 32 }
  0x40   :  { %290 = vmatprep.mubr.msk.bf16.mxu0 %vm404_vm0, %v403_v1  ;;  %p371_p10 = scmp.ne.s32.totalorder %s253_s18, %s370_s19  ;;  %p375_p11 = scmp.lt.s32.totalorder %s253_s18, %s253_s18 }
  0x41   :  { %p376_p12 = scmp.lt.s32.totalorder %s374_s5, %s370_s19 }
  0x42   :  { %283 = vmatpush3.bf16.msra.mxu1 %v132_v12 }
  0x43   :  { %p377_p13 = por %p376_p12, %p375_p11 }
  0x45   :  { %p378_p0 = pnand %p377_p13, %p371_p10 }
  0xbc   :  { %v192_v37 = vpop.permute.xlu0 %191 }
  0xbd   :  { %v197_v38 = vrot.slane %v192_v37, %v196_v36 }
 0x112   :  { %v119_v14 = vpop.f32.mrb[0].mxu0 }
 0x113   :  { %v120_v15 = vadd.f32 %v262_v13, %v119_v14  ;;  %v278_v16 = vpop.f32.mrb[1].mxu0 }
 0x114   :  { %v122_v17 = vpop.f32.mrb[2].mxu0 }
 0x115   :  { %v125_v18 = vmax.f32 %v120_v15, 0.0  ;;  %v279_v19 = vpop.f32.mrb[3].mxu0 }
 0x117   :  { %v126_v20 = vpack.c.bf16 %v125_v18, %v125_v18 }
 0x119   :  { %285 = vmatmul.mubr.msk.bf16.vlgmr.msra.gmra.mrb[0].mxu1 %vm140_vm2, %v126_v20 }
 0x1ec   :  { %v178_v24 = vpop.f32.mrb[0].mxu1 }
 0x1ed   :  { %v179_v25 = vadd.f32 %v264_v23, %v178_v24  ;;  %v286_v26 = vpop.f32.mrb[1].mxu1 }
 0x1ee   :  { %v181_v27 = vpop.f32.mrb[2].mxu1 }
 0x1ef   :  { %v184_v28 = vmax.f32 %v179_v25, 0.0  ;;  %v287_v29 = vpop.f32.mrb[3].mxu1 }
 0x1f1   :  { %v185_v30 = vpack.c.bf16 %v184_v28, %v184_v28 }
 0x1f3   :  { %v202_v31 = vsel %vm140_vm2, %v185_v30, 0 }
 0x1f4   :  { %289 = vmatpush3.bf16.xpose.msra.mxu0 %v202_v31 }
 0x1fb   :  { %291 = vmatmul.mubr.msk.bf16.vlgmr.msra.gmra.mrb[4].mxu0 %vm140_vm2, %v187_v33 }
 0x2ce   :  { %v238_v39 = vpop.f32.mrb[4].mxu0 }
 0x2cf   :  { %v239_v40 = vadd.f32 %v238_v39, %v197_v38  ;;  %v292_v41 = vpop.f32.mrb[5].mxu0 }
 0x2d0   :  { %v241_v42 = vpop.f32.mrb[6].mxu0 }
 0x2d1   :  { %v293_v43 = vpop.f32.mrb[7].mxu0  ;;  %245 = vst.msk [vmem:[#allocation9] sm:$0x1] %vm244_vm3, %v239_v40 }
 0x2d2   :  { %381 = shalt.err (!%p378_p0)
}
 0x2d3   :  { %s382_s22 = scalar_lea.hbm %s523_s7, 16 }
 0x2d4   :  { %p383_p1 = scmp.ne.s32.totalorder %s523_s7, %s382_s22  ;;  %p386_p2 = scmp.lt.u32.totalorder %s382_s22, %s523_s7 }
 0x2d6   :  { %p388_p3 = pnand %p386_p2, %p383_p1 }
 0x2d8   :  { %391 = shalt.err (!%p388_p3)
}
 0x2d9   :  { %255 = dma.vmem_to_hbm [thread:$0]  %s253_s18, 16, %s523_s7, [#allocation5]  }
 0x2da   :  { %396 = dma.done.wait [#allocation5], 16  }
 0x2db   :  { %397 = vsyncadd [#allocation5], 4294967280 }
 0x2dc   :  { %259 = vsyncpa [#allocation4], 1 }
 0x2dd   :  { %260 = vsyncpa [#allocation7], 1 }
 0x2de   :  { %261 = vsyncpa [#allocation5], 1 }

</bundles_post_ra>
